<compile_context>
chip_gen: v6e
topology: v6e:2x2x1
jax: 0.10.0
libtpu: 0.0.40
codegen_flags: <defaults>
</compile_context>

<pallas_src>
import functools

import jax
import jax.numpy as jnp
from jax.experimental import pallas as pl
from jax.experimental.pallas import tpu as pltpu


def _round_up(a, m):
    return (a + m - 1) // m * m


def _vmem_budget_bytes():
    """Per-generation VMEM budget (<= ~48 MiB on v7x, ~96 MiB on v5e/v6e)."""
    cap = 64 * 1024 * 1024
    try:
        info = pltpu.get_tpu_info()
        cap = int(getattr(info, "vmem_capacity_bytes", cap))
    except Exception:
        pass
    return min(cap * 3 // 4, 100 * 1024 * 1024)


def _resident_spec(shape):
    """Constant-index (resident) operand; single-buffered when supported."""
    index_map = lambda *idx: (0,) * len(shape)
    try:
        return pl.BlockSpec(shape, index_map, pipeline_mode=pl.Buffered(1))
    except Exception:
        return pl.BlockSpec(shape, index_map)


# --------------------------------------------------------------------------
# Kernel 1: encoder -> stats head -> reparameterize -> decoder hidden
# --------------------------------------------------------------------------
def msvae_encoder_kernel(x_ref, eps_ref,
                         w_enc_ref, b_enc_ref,
                         w_stats_ref, b_stats_ref,
                         w_dec1_ref, b_dec1_ref,
                         stats_ref, h2_ref):
    """Grid = (batch tile i,). bf16 MXU matmuls, f32 bias/relu/exp."""
    L = eps_ref.shape[-1]

    # ---- encoder: h = relu(x @ W_enc + b_enc) ----
    h = jnp.dot(x_ref[...], w_enc_ref[...], preferred_element_type=jnp.float32)
    h = jnp.maximum(h + b_enc_ref[...], 0.0)

    # ---- fused stats head: [mean || logvar || pad] = h @ W_stats + b_stats ----
    stats = jnp.dot(h.astype(jnp.bfloat16), w_stats_ref[...],
                    preferred_element_type=jnp.float32) + b_stats_ref[...]
    stats_ref[...] = stats                     # lane-dense (padded to 128) store

    mean = stats[:, :L]
    logvar = stats[:, L:2 * L]

    # ---- reparameterize: z = mean + eps * exp(0.5 * logvar) ----
    z = mean + eps_ref[...] * jnp.exp(0.5 * logvar)

    # ---- decoder hidden: h2 = relu(z @ W_d1 + b_d1), stored bf16 ----
    h2 = jnp.dot(z.astype(jnp.bfloat16), w_dec1_ref[...],
                 preferred_element_type=jnp.float32)
    h2_ref[...] = jnp.maximum(h2 + b_dec1_ref[...], 0.0).astype(h2_ref.dtype)


# --------------------------------------------------------------------------
# Kernel 2: decoder logits (column-tiled, both grid axes independent)
# --------------------------------------------------------------------------
def msvae_decoder_kernel(h2_ref, w_dec2_ref, b_dec2_ref, logits_ref):
    """Grid = (column tile n, batch tile b); both axes "parallel".

    w_dec2/b_dec2 are pre-tiled to (num_n, H, TILE_N) / (num_n, 1, TILE_N):
      * resident mode: full array in VMEM, select the tile with a leading-dim
        dynamic index (n) -> weight read from HBM exactly once.
      * streaming mode: ref holds one column tile (leading dim 1); with the
        column axis outermost the tile is fetched once per n (weight-stationary).
    Bias is always fully resident -> no per-step bias DMA.
    """
    n = pl.program_id(0)
    w = w_dec2_ref[0] if w_dec2_ref.shape[0] == 1 else w_dec2_ref[n]
    b = b_dec2_ref[0] if b_dec2_ref.shape[0] == 1 else b_dec2_ref[n]
    acc = jnp.dot(h2_ref[...], w, preferred_element_type=jnp.float32) + b
    logits_ref[...] = acc.astype(logits_ref.dtype)     # bf16, lane-dense


# --------------------------------------------------------------------------
# Parameter preparation (done once, outside the hot path)
# --------------------------------------------------------------------------
def prepare_params(params, *, tile_n=512):
    """Fuse mean/logvar heads, lane-pad, pre-tile the decoder output projection
    and cast weights to bf16 (biases stay f32)."""
    (w_enc, b_enc, w_mean, b_mean, w_logvar, b_logvar,
     w_dec1, b_dec1, w_dec2, b_dec2) = params
    H = w_enc.shape[1]
    L = w_mean.shape[1]
    OUT = w_dec2.shape[1]
    bf = jnp.bfloat16

    # Fused + lane-padded (multiple of 128) stats head.
    SP = _round_up(2 * L, 128)
    w_stats = jnp.concatenate([w_mean, w_logvar], axis=1)     # (H, 2L)
    b_stats = jnp.concatenate([b_mean, b_logvar], axis=1)     # (1, 2L)
    if SP != 2 * L:
        w_stats = jnp.pad(w_stats, ((0, 0), (0, SP - 2 * L)))
        b_stats = jnp.pad(b_stats, ((0, 0), (0, SP - 2 * L)))

    # Decoder output projection: pad columns to a lane-dense multiple of the
    # column tile, then pre-tile to (num_n, H, TILE_N) / (num_n, 1, TILE_N).
    OUT_pad = _round_up(OUT, 128)
    if OUT_pad > tile_n:
        OUT_pad = _round_up(OUT_pad, tile_n)
    TILE_N = min(tile_n, OUT_pad)
    if OUT_pad != OUT:
        w_dec2 = jnp.pad(w_dec2, ((0, 0), (0, OUT_pad - OUT)))
        b_dec2 = jnp.pad(b_dec2, ((0, 0), (0, OUT_pad - OUT)))
    num_n = OUT_pad // TILE_N
    w_dec2_t = (w_dec2.reshape(H, num_n, TILE_N)
                .transpose(1, 0, 2).astype(bf))                # (num_n, H, TILE_N)
    b_dec2_t = b_dec2.reshape(num_n, 1, TILE_N).astype(jnp.float32)

    return (w_enc.astype(bf), b_enc.astype(jnp.float32),
            w_stats.astype(bf), b_stats.astype(jnp.float32),
            w_dec1.astype(bf), b_dec1.astype(jnp.float32),
            w_dec2_t, b_dec2_t)


# --------------------------------------------------------------------------
# Fused forward
# --------------------------------------------------------------------------
@functools.partial(jax.jit, static_argnames=("max_frequency", "tile_b"))
def msvae_forward(x, eps, kparams, *, max_frequency, tile_b=256):
    """Fused MSVAE forward. Returns (logits[B, D, F], mean[B, L], logvar[B, L])."""
    (w_enc, b_enc, w_stats, b_stats,
     w_dec1, b_dec1, w_dec2_t, b_dec2_t) = kparams

    B, Din = x.shape
    L = eps.shape[1]
    H = w_enc.shape[1]
    SP = w_stats.shape[1]
    num_n, _, TILE_N = w_dec2_t.shape
    OUT_pad = num_n * TILE_N
    OUT = Din * max_frequency
    assert OUT <= OUT_pad, "decoder weights were prepared for a smaller OUT"

    vmem_limit = _vmem_budget_bytes()

    # ---- batch padding / tiling ----
    B_pad = _round_up(B, 8)
    if B_pad > tile_b:
        B_pad = _round_up(B_pad, tile_b)
        TILE_B = tile_b
    else:
        TILE_B = B_pad
    x = x.astype(jnp.bfloat16)                       # halve x DMA, MXU uses bf16 anyway
    if B_pad != B:
        x = jnp.pad(x, ((0, B_pad - B), (0, 0)))
        eps = jnp.pad(eps, ((0, B_pad - B), (0, 0)))
    num_b = B_pad // TILE_B

    # ---------------- kernel 1: encoder / stats / reparam / decoder hidden ----
    stats, h2 = pl.pallas_call(
        msvae_encoder_kernel,
        out_shape=(
            jax.ShapeDtypeStruct((B_pad, SP), jnp.float32),    # [mean||logvar||pad]
            jax.ShapeDtypeStruct((B_pad, H), jnp.bfloat16),    # decoder hidden
        ),
        grid=(num_b,),
        in_specs=[
            pl.BlockSpec((TILE_B, Din), lambda i: (i, 0)),     # x (bf16)
            pl.BlockSpec((TILE_B, L), lambda i: (i, 0)),       # eps (f32)
            _resident_spec((Din, H)),                          # w_enc (bf16)
            _resident_spec((1, H)),                            # b_enc (f32)
            _resident_spec((H, SP)),                           # w_stats (bf16)
            _resident_spec((1, SP)),                           # b_stats (f32)
            _resident_spec((L, H)),                            # w_dec1 (bf16)
            _resident_spec((1, H)),                            # b_dec1 (f32)
        ],
        out_specs=(
            pl.BlockSpec((TILE_B, SP), lambda i: (i, 0)),
            pl.BlockSpec((TILE_B, H), lambda i: (i, 0)),
        ),
        compiler_params=pltpu.CompilerParams(
            dimension_semantics=("parallel",),
            vmem_limit_bytes=vmem_limit),
    )(x, eps, w_enc, b_enc, w_stats, b_stats, w_dec1, b_dec1)

    # ---------------- kernel 2: decoder logits ----------------
    # Keep w_dec2 fully resident when it fits the per-generation budget
    # (conservative: <= 1/3 of the limit, so it fits even if double-buffered);
    # otherwise stream column tiles weight-stationary (column axis outermost).
    w_dec2_bytes = int(w_dec2_t.size) * 2
    resident = w_dec2_bytes <= vmem_limit // 3
    if resident:
        w_spec = _resident_spec((num_n, H, TILE_N))
    else:
        w_spec = pl.BlockSpec((1, H, TILE_N), lambda n, b: (n, 0, 0))
    b_spec = _resident_spec((num_n, 1, TILE_N))                # bias always resident

    logits_pad = pl.pallas_call(
        msvae_decoder_kernel,
        out_shape=jax.ShapeDtypeStruct((B_pad, OUT_pad), jnp.bfloat16),
        grid=(num_n, num_b),
        in_specs=[
            pl.BlockSpec((TILE_B, H), lambda n, b: (b, 0)),    # h2 (bf16, small)
            w_spec,                                            # w_dec2 tiles (bf16)
            b_spec,                                            # b_dec2 tiles (f32)
        ],
        out_specs=pl.BlockSpec((TILE_B, TILE_N), lambda n, b: (b, n)),
        compiler_params=pltpu.CompilerParams(
            dimension_semantics=("parallel", "parallel"),
            vmem_limit_bytes=vmem_limit),
    )(h2, w_dec2_t, b_dec2_t)

    logits = logits_pad[:B, :OUT].astype(jnp.float32).reshape(B, Din, max_frequency)
    mean = stats[:B, :L]
    logvar = stats[:B, L:2 * L]
    return logits, mean, logvar


# --------------------------------------------------------------------------
# Synthetic parameters and pure-JAX reference
# --------------------------------------------------------------------------
def init_params(key, max_input_dim, hidden_dim, latent_dim, max_frequency):
    """Deterministic synthetic parameter init (shapes match the torch module,
    but weights are stored transposed: (in, out))."""
    ks = jax.random.split(key, 10)
    s = 0.1
    w_enc = s * jax.random.normal(ks[0], (max_input_dim, hidden_dim), jnp.float32)
    b_enc = s * jax.random.normal(ks[1], (1, hidden_dim), jnp.float32)
    w_mean = s * jax.random.normal(ks[2], (hidden_dim, latent_dim), jnp.float32)
    b_mean = s * jax.random.normal(ks[3], (1, latent_dim), jnp.float32)
    w_logvar = s * jax.random.normal(ks[4], (hidden_dim, latent_dim), jnp.float32)
    b_logvar = s * jax.random.normal(ks[5], (1, latent_dim), jnp.float32)
    w_dec1 = s * jax.random.normal(ks[6], (latent_dim, hidden_dim), jnp.float32)
    b_dec1 = s * jax.random.normal(ks[7], (1, hidden_dim), jnp.float32)
    w_dec2 = s * jax.random.normal(
        ks[8], (hidden_dim, max_input_dim * max_frequency), jnp.float32)
    b_dec2 = s * jax.random.normal(
        ks[9], (1, max_input_dim * max_frequency), jnp.float32)
    return (w_enc, b_enc, w_mean, b_mean, w_logvar, b_logvar,
            w_dec1, b_dec1, w_dec2, b_dec2)


def msvae_forward_ref(x, eps, params):
    """Pure-JAX reference with the same bf16-matmul / f32-accumulate recipe."""
    (w_enc, b_enc, w_mean, b_mean, w_logvar, b_logvar,
     w_dec1, b_dec1, w_dec2, b_dec2) = params
    bf = jnp.bfloat16

    def mm(a, w):
        return jnp.dot(a.astype(bf), w.astype(bf),
                       preferred_element_type=jnp.float32)

    h = jnp.maximum(mm(x, w_enc) + b_enc, 0.0)
    mean = mm(h, w_mean) + b_mean
    logvar = mm(h, w_logvar) + b_logvar
    z = mean + eps * jnp.exp(0.5 * logvar)
    h2 = jnp.maximum(mm(z, w_dec1) + b_dec1, 0.0)
    logits = mm(h2, w_dec2) + b_dec2
    return logits, mean, logvar


if __name__ == "__main__":
    # Small shapes consistent with the module's forward.
    B = 8                 # batch
    MAX_INPUT_DIM = 16    # max_input_dim (== decoder max_output_dim)
    HIDDEN_DIM = 32
    LATENT_DIM = 8
    MAX_FREQUENCY = 4

    key = jax.random.PRNGKey(0)
    k_x, k_eps, k_p = jax.random.split(key, 3)

    # `batch` in the torch module is a float tensor of degree-count features.
    x = jax.random.uniform(k_x, (B, MAX_INPUT_DIM), jnp.float32, 0.0, 3.0)
    # eps for reparameterization (torch.randn_like(std)) — deterministic here.
    eps = jax.random.normal(k_eps, (B, LATENT_DIM), jnp.float32)

    params = init_params(k_p, MAX_INPUT_DIM, HIDDEN_DIM, LATENT_DIM, MAX_FREQUENCY)
    kparams = prepare_params(params, tile_n=512)

    logits, mean, logvar = msvae_forward(x, eps, kparams,
                                         max_frequency=MAX_FREQUENCY)
    jax.block_until_ready((logits, mean, logvar))

    # sanity check against pure-JAX reference (same bf16/f32 precision recipe;
    # kernel additionally rounds the logits to bf16 on writeback).
    logits_ref, mean_ref, logvar_ref = msvae_forward_ref(x, eps, params)
    assert logits.shape == (B, MAX_INPUT_DIM, MAX_FREQUENCY)
    assert mean.shape == (B, LATENT_DIM) and logvar.shape == (B, LATENT_DIM)
    assert jnp.allclose(
        logits, logits_ref.reshape(B, MAX_INPUT_DIM, MAX_FREQUENCY),
        atol=1e-2, rtol=1e-2)
    assert jnp.allclose(mean, mean_ref, atol=5e-3, rtol=5e-3)
    assert jnp.allclose(logvar, logvar_ref, atol=5e-3, rtol=5e-3)

    # TODO(synk): `generate()` (multinomial sampling + fix_degree_sum_even +
    # decode_degree_sequence) is host-side Python with data-dependent list
    # building; not implemented as a kernel.

    print("KERNEL_OK")
</pallas_src>

<mosaic_0001>
module attributes {stable_mosaic.version = 11 : i64} {
  func.func @msvae_encoder_kernel(%arg0: i32, %arg1: memref<8x16xbf16, #tpu.memory_space<vmem>>, %arg2: memref<8x8xf32, #tpu.memory_space<vmem>>, %arg3: memref<16x32xbf16, #tpu.memory_space<vmem>>, %arg4: memref<1x32xf32, #tpu.memory_space<vmem>>, %arg5: memref<32x128xbf16, #tpu.memory_space<vmem>>, %arg6: memref<1x128xf32, #tpu.memory_space<vmem>>, %arg7: memref<8x32xbf16, #tpu.memory_space<vmem>>, %arg8: memref<1x32xf32, #tpu.memory_space<vmem>>, %arg9: memref<8x128xf32, #tpu.memory_space<vmem>>, %arg10: memref<8x32xbf16, #tpu.memory_space<vmem>>) attributes {dimension_semantics = [#tpu.dimension_semantics<parallel>], iteration_bounds = array<i64: 1>, scalar_prefetch = 0 : i64, scratch_operands = 0 : i64, tpu.core_type = #tpu.core_type<tc>, window_params = [{transform_indices = @transform_0, window_bounds = array<i64: 8, 16>}, {transform_indices = @transform_1, window_bounds = array<i64: 8, 8>}, {pipeline_mode = #tpu.pipeline_mode<synchronous>, transform_indices = @transform_2, window_bounds = array<i64: 16, 32>}, {pipeline_mode = #tpu.pipeline_mode<synchronous>, transform_indices = @transform_3, window_bounds = array<i64: 1, 32>}, {pipeline_mode = #tpu.pipeline_mode<synchronous>, transform_indices = @transform_4, window_bounds = array<i64: 32, 128>}, {pipeline_mode = #tpu.pipeline_mode<synchronous>, transform_indices = @transform_5, window_bounds = array<i64: 1, 128>}, {pipeline_mode = #tpu.pipeline_mode<synchronous>, transform_indices = @transform_6, window_bounds = array<i64: 8, 32>}, {pipeline_mode = #tpu.pipeline_mode<synchronous>, transform_indices = @transform_7, window_bounds = array<i64: 1, 32>}, {transform_indices = @transform_8, window_bounds = array<i64: 8, 128>}, {transform_indices = @transform_9, window_bounds = array<i64: 8, 32>}]} {
    %c0 = arith.constant 0 : index
    %c0_0 = arith.constant 0 : index
    %0 = vector.load %arg1[%c0, %c0_0] : memref<8x16xbf16, #tpu.memory_space<vmem>>, vector<8x16xbf16>
    %c0_1 = arith.constant 0 : index
    %c0_2 = arith.constant 0 : index
    %1 = vector.load %arg3[%c0_1, %c0_2] : memref<16x32xbf16, #tpu.memory_space<vmem>>, vector<16x32xbf16>
    %cst = arith.constant dense<0.000000e+00> : vector<8x32xf32>
    %2 = tpu.matmul %0, %1, %cst {dimension_numbers = #tpu.dot_dimension_numbers<[1], [0], [0], [1], [0, 0, 1, 1], [], []>} : vector<8x16xbf16>, vector<16x32xbf16>, vector<8x32xf32> -> vector<8x32xf32>
    %c0_3 = arith.constant 0 : index
    %c0_4 = arith.constant 0 : index
    %3 = vector.load %arg4[%c0_3, %c0_4] : memref<1x32xf32, #tpu.memory_space<vmem>>, vector<1x32xf32>
    %4 = vector.broadcast %3 : vector<1x32xf32> to vector<8x32xf32>
    %5 = arith.addf %2, %4 : vector<8x32xf32>
    %cst_5 = arith.constant 0.000000e+00 : f32
    %6 = vector.broadcast %cst_5 : f32 to vector<8x32xf32>
    %7 = arith.maximumf %5, %6 : vector<8x32xf32>
    %8 = arith.truncf %7 : vector<8x32xf32> to vector<8x32xbf16>
    %c0_6 = arith.constant 0 : index
    %c0_7 = arith.constant 0 : index
    %9 = vector.load %arg5[%c0_6, %c0_7] : memref<32x128xbf16, #tpu.memory_space<vmem>>, vector<32x128xbf16>
    %cst_8 = arith.constant dense<0.000000e+00> : vector<8x128xf32>
    %10 = tpu.matmul %8, %9, %cst_8 {dimension_numbers = #tpu.dot_dimension_numbers<[1], [0], [0], [1], [0, 0, 1, 1], [], []>} : vector<8x32xbf16>, vector<32x128xbf16>, vector<8x128xf32> -> vector<8x128xf32>
    %c0_9 = arith.constant 0 : index
    %c0_10 = arith.constant 0 : index
    %11 = vector.load %arg6[%c0_9, %c0_10] : memref<1x128xf32, #tpu.memory_space<vmem>>, vector<1x128xf32>
    %12 = vector.broadcast %11 : vector<1x128xf32> to vector<8x128xf32>
    %13 = arith.addf %10, %12 : vector<8x128xf32>
    %c0_11 = arith.constant 0 : index
    %c0_12 = arith.constant 0 : index
    %14 = vector.load %arg9[%c0_11, %c0_12] : memref<8x128xf32, #tpu.memory_space<vmem>>, vector<8x128xf32>
    tpu.vector_store %arg9[%c0_11, %c0_12], %13 {strides = array<i32>} : memref<8x128xf32, #tpu.memory_space<vmem>>, vector<8x128xf32>,
    %15 = vector.extract_strided_slice %13 {offsets = [0, 0], sizes = [8, 8], strides = [1, 1]} : vector<8x128xf32> to vector<8x8xf32>
    %16 = vector.extract_strided_slice %13 {offsets = [0, 8], sizes = [8, 8], strides = [1, 1]} : vector<8x128xf32> to vector<8x8xf32>
    %c0_13 = arith.constant 0 : index
    %c0_14 = arith.constant 0 : index
    %17 = vector.load %arg2[%c0_13, %c0_14] : memref<8x8xf32, #tpu.memory_space<vmem>>, vector<8x8xf32>
    %cst_15 = arith.constant 5.000000e-01 : f32
    %18 = vector.broadcast %cst_15 : f32 to vector<8x8xf32>
    %19 = arith.mulf %18, %16 : vector<8x8xf32>
    %20 = math.exp %19 : vector<8x8xf32>
    %21 = arith.mulf %17, %20 : vector<8x8xf32>
    %22 = arith.addf %15, %21 : vector<8x8xf32>
    %23 = arith.truncf %22 : vector<8x8xf32> to vector<8x8xbf16>
    %c0_16 = arith.constant 0 : index
    %c0_17 = arith.constant 0 : index
    %24 = vector.load %arg7[%c0_16, %c0_17] : memref<8x32xbf16, #tpu.memory_space<vmem>>, vector<8x32xbf16>
    %cst_18 = arith.constant dense<0.000000e+00> : vector<8x32xf32>
    %25 = tpu.matmul %23, %24, %cst_18 {dimension_numbers = #tpu.dot_dimension_numbers<[1], [0], [0], [1], [0, 0, 1, 1], [], []>} : vector<8x8xbf16>, vector<8x32xbf16>, vector<8x32xf32> -> vector<8x32xf32>
    %c0_19 = arith.constant 0 : index
    %c0_20 = arith.constant 0 : index
    %26 = vector.load %arg8[%c0_19, %c0_20] : memref<1x32xf32, #tpu.memory_space<vmem>>, vector<1x32xf32>
    %27 = vector.broadcast %26 : vector<1x32xf32> to vector<8x32xf32>
    %28 = arith.addf %25, %27 : vector<8x32xf32>
    %cst_21 = arith.constant 0.000000e+00 : f32
    %29 = vector.broadcast %cst_21 : f32 to vector<8x32xf32>
    %30 = arith.maximumf %28, %29 : vector<8x32xf32>
    %31 = arith.truncf %30 : vector<8x32xf32> to vector<8x32xbf16>
    %c0_22 = arith.constant 0 : index
    %c0_23 = arith.constant 0 : index
    %32 = vector.load %arg10[%c0_22, %c0_23] : memref<8x32xbf16, #tpu.memory_space<vmem>>, vector<8x32xbf16>
    tpu.vector_store %arg10[%c0_22, %c0_23], %31 {strides = array<i32>} : memref<8x32xbf16, #tpu.memory_space<vmem>>, vector<8x32xbf16>,
    return
  }
  func.func @transform_0(%arg0: i32) -> (i32, i32) {
    %c0_i32 = arith.constant 0 : i32
    %c0_i32_0 = arith.constant 0 : i32
    return %arg0, %c0_i32 : i32, i32
  }
  func.func @transform_1(%arg0: i32) -> (i32, i32) {
    %c0_i32 = arith.constant 0 : i32
    %c0_i32_0 = arith.constant 0 : i32
    return %arg0, %c0_i32 : i32, i32
  }
  func.func @transform_2(%arg0: i32) -> (i32, i32) {
    %c0_i32 = arith.constant 0 : i32
    %c0_i32_0 = arith.constant 0 : i32
    %c0_i32_1 = arith.constant 0 : i32
    return %c0_i32, %c0_i32_0 : i32, i32
  }
  func.func @transform_3(%arg0: i32) -> (i32, i32) {
    %c0_i32 = arith.constant 0 : i32
    %c0_i32_0 = arith.constant 0 : i32
    %c0_i32_1 = arith.constant 0 : i32
    return %c0_i32, %c0_i32_0 : i32, i32
  }
  func.func @transform_4(%arg0: i32) -> (i32, i32) {
    %c0_i32 = arith.constant 0 : i32
    %c0_i32_0 = arith.constant 0 : i32
    %c0_i32_1 = arith.constant 0 : i32
    return %c0_i32, %c0_i32_0 : i32, i32
  }
  func.func @transform_5(%arg0: i32) -> (i32, i32) {
    %c0_i32 = arith.constant 0 : i32
    %c0_i32_0 = arith.constant 0 : i32
    %c0_i32_1 = arith.constant 0 : i32
    return %c0_i32, %c0_i32_0 : i32, i32
  }
  func.func @transform_6(%arg0: i32) -> (i32, i32) {
    %c0_i32 = arith.constant 0 : i32
    %c0_i32_0 = arith.constant 0 : i32
    %c0_i32_1 = arith.constant 0 : i32
    return %c0_i32, %c0_i32_0 : i32, i32
  }
  func.func @transform_7(%arg0: i32) -> (i32, i32) {
    %c0_i32 = arith.constant 0 : i32
    %c0_i32_0 = arith.constant 0 : i32
    %c0_i32_1 = arith.constant 0 : i32
    return %c0_i32, %c0_i32_0 : i32, i32
  }
  func.func @transform_8(%arg0: i32) -> (i32, i32) {
    %c0_i32 = arith.constant 0 : i32
    %c0_i32_0 = arith.constant 0 : i32
    return %arg0, %c0_i32 : i32, i32
  }
  func.func @transform_9(%arg0: i32) -> (i32, i32) {
    %c0_i32 = arith.constant 0 : i32
    %c0_i32_0 = arith.constant 0 : i32
    return %arg0, %c0_i32 : i32, i32
  }
}

module attributes {stable_mosaic.version = 11 : i64} {
  func.func @msvae_decoder_kernel(%arg0: i32, %arg1: i32, %arg2: memref<8x32xbf16, #tpu.memory_space<vmem>>, %arg3: memref<1x32x128xbf16, #tpu.memory_space<vmem>>, %arg4: memref<1x1x128xf32, #tpu.memory_space<vmem>>, %arg5: memref<8x128xbf16, #tpu.memory_space<vmem>>) attributes {dimension_semantics = [#tpu.dimension_semantics<parallel>, #tpu.dimension_semantics<parallel>], iteration_bounds = array<i64: 1, 1>, scalar_prefetch = 0 : i64, scratch_operands = 0 : i64, tpu.core_type = #tpu.core_type<tc>, window_params = [{transform_indices = @transform_0, window_bounds = array<i64: 8, 32>}, {pipeline_mode = #tpu.pipeline_mode<synchronous>, transform_indices = @transform_1, window_bounds = array<i64: 1, 32, 128>}, {pipeline_mode = #tpu.pipeline_mode<synchronous>, transform_indices = @transform_2, window_bounds = array<i64: 1, 1, 128>}, {transform_indices = @transform_3, window_bounds = array<i64: 8, 128>}]} {
    %c0 = arith.constant 0 : index
    %c0_0 = arith.constant 0 : index
    %c0_1 = arith.constant 0 : index
    %0 = vector.load %arg3[%c0, %c0_0, %c0_1] : memref<1x32x128xbf16, #tpu.memory_space<vmem>>, vector<1x32x128xbf16>
    %1 = vector.shape_cast %0 : vector<1x32x128xbf16> to vector<32x128xbf16>
    %c0_2 = arith.constant 0 : index
    %c0_3 = arith.constant 0 : index
    %c0_4 = arith.constant 0 : index
    %2 = vector.load %arg4[%c0_2, %c0_3, %c0_4] : memref<1x1x128xf32, #tpu.memory_space<vmem>>, vector<1x1x128xf32>
    %3 = vector.shape_cast %2 : vector<1x1x128xf32> to vector<1x128xf32>
    %c0_5 = arith.constant 0 : index
    %c0_6 = arith.constant 0 : index
    %4 = vector.load %arg2[%c0_5, %c0_6] : memref<8x32xbf16, #tpu.memory_space<vmem>>, vector<8x32xbf16>
    %cst = arith.constant dense<0.000000e+00> : vector<8x128xf32>
    %5 = tpu.matmul %4, %1, %cst {dimension_numbers = #tpu.dot_dimension_numbers<[1], [0], [0], [1], [0, 0, 1, 1], [], []>} : vector<8x32xbf16>, vector<32x128xbf16>, vector<8x128xf32> -> vector<8x128xf32>
    %6 = vector.broadcast %3 : vector<1x128xf32> to vector<8x128xf32>
    %7 = arith.addf %5, %6 : vector<8x128xf32>
    %8 = arith.truncf %7 : vector<8x128xf32> to vector<8x128xbf16>
    %c0_7 = arith.constant 0 : index
    %c0_8 = arith.constant 0 : index
    %9 = vector.load %arg5[%c0_7, %c0_8] : memref<8x128xbf16, #tpu.memory_space<vmem>>, vector<8x128xbf16>
    tpu.vector_store %arg5[%c0_7, %c0_8], %8 {strides = array<i32>} : memref<8x128xbf16, #tpu.memory_space<vmem>>, vector<8x128xbf16>,
    return
  }
  func.func @transform_0(%arg0: i32, %arg1: i32) -> (i32, i32) {
    %c0_i32 = arith.constant 0 : i32
    %c0_i32_0 = arith.constant 0 : i32
    return %arg1, %c0_i32 : i32, i32
  }
  func.func @transform_1(%arg0: i32, %arg1: i32) -> (i32, i32, i32) {
    %c0_i32 = arith.constant 0 : i32
    %c0_i32_0 = arith.constant 0 : i32
    %c0_i32_1 = arith.constant 0 : i32
    %c0_i32_2 = arith.constant 0 : i32
    return %c0_i32, %c0_i32_0, %c0_i32_1 : i32, i32, i32
  }
  func.func @transform_2(%arg0: i32, %arg1: i32) -> (i32, i32, i32) {
    %c0_i32 = arith.constant 0 : i32
    %c0_i32_0 = arith.constant 0 : i32
    %c0_i32_1 = arith.constant 0 : i32
    %c0_i32_2 = arith.constant 0 : i32
    return %c0_i32, %c0_i32_0, %c0_i32_1 : i32, i32, i32
  }
  func.func @transform_3(%arg0: i32, %arg1: i32) -> (i32, i32) {
    %c0_i32 = arith.constant 0 : i32
    return %arg1, %arg0 : i32, i32
  }
}

</mosaic_0001>

<bundles_post_ra>
// kernel: msvae_forward.3
= control target key start
LH: loop header
LB: loop body
LE: loop exit
PB: predicated region body
PF: predicated region fallthrough
CT: control target
= control target key end

     0   :  { %v108_v0 = vmov 0.0   ;;  %vm109_vm0 = vmmov 0   ;;  %vm39_vm1 = vcmask 261120   ;;  %s145_s1 = inlined_call_operand.vmem [shape: bf16[1,32,128], index: 1, kind: input, shape index: {}]   ;;  %s146_s0 = inlined_call_operand.vmem [shape: bf16[8,32], index: 0, kind: input, shape index: {}]   ;;  %s147_s2 = inlined_call_operand.vmem [shape: f32[1,1,128], index: 2, kind: input, shape index: {}]   ;;  %s148_s3 = inlined_call_operand.vmem [shape: bf16[8,128], index: 3, kind: output, shape index: {}]  }
   0x1   :  { %96 = vmatprep.subr.bf16.mxu0 %v108_v0  ;;  %v106_v1 = vld [vmem:[%s145_s1 + $0x8] sm:$0xff]   ;;  %100 = vmatprep.mubr.msk.bf16.mxu0 %vm109_vm0, %v108_v0  ;;  %v107_v2 = vld [vmem:[%s145_s1] sm:$0xff]  }
   0x2   :  { %97 = vmatpush3.bf16.msra.mxu0 %v106_v1  ;;  %v20_v3 = vld [vmem:[%s146_s0] sm:$0xf] }
   0x3   :  { %98 = vmatprep.subr.bf16.mxu0 %v108_v0  ;;  %v89_v4 = vld [vmem:[%s147_s2] ss:$0 sm:$0xff] }
   0x6   :  { %99 = vmatpush3.bf16.msra.mxu0 %v107_v2 }
   0x9   :  { %101 = vmatmul.mubr.msk.bf16.vlgmr.msra.gmra.mxu0 %vm39_vm1, %v20_v3 }
  0xc9   :  { %v77_v5 = vpop.f32.mrf.mxu0 }
  0xca   :  { %v78_v6 = vadd.f32 %v89_v4, %v77_v5 }
  0xcb   :  { %v102_v7 = vpop.f32.mrf.mxu0 }
  0xcc   :  { %v83_v8 = vpack.c.bf16 %v78_v6, %v78_v6 }
  0xcd   :  { %v80_v9 = vpop.f32.mrf.mxu0 }
  0xce   :  { %84 = vst [vmem:[%s148_s3] sm:$0xf] %v83_v8 }
  0xcf   :  { %v103_v10 = vpop.f32.mrf.mxu0 }

// kernel: msvae_forward.2
= control target key start
LH: loop header
LB: loop body
LE: loop exit
PB: predicated region body
PF: predicated region fallthrough
CT: control target
= control target key end

     0   :  { %15 = vsyncpa [#allocation3], 0  ;;  %s554_s0 = inlined_call_operand.vmem [shape: bf16[8,16], index: 0, kind: input, shape index: {}]   ;;  %s555_s1 = inlined_call_operand.vmem [shape: f32[8,8], index: 1, kind: input, shape index: {}]   ;;  %s556_s2 = inlined_call_operand.hbm [shape: bf16[16,32], index: 2, kind: input, shape index: {}]   ;;  %s557_s3 = inlined_call_operand.hbm [shape: f32[1,32], index: 3, kind: input, shape index: {}]   ;;  %s558_s4 = inlined_call_operand.vmem [shape: bf16[32,128], index: 4, kind: input, shape index: {}]   ;;  %s559_s5 = inlined_call_operand.hbm [shape: f32[1,128], index: 5, kind: input, shape index: {}]   ;;  %s560_s6 = inlined_call_operand.hbm [shape: bf16[8,32], index: 6, kind: input, shape index: {}]   ;;  %s561_s7 = inlined_call_operand.hbm [shape: f32[1,32], index: 7, kind: input, shape index: {}]   ;;  %s562_s8 = inlined_call_operand.vmem [shape: f32[8,128], index: 8, kind: output, shape index: {0}]   ;;  %s563_s9 = inlined_call_operand.vmem [shape: bf16[8,32], index: 9, kind: output, shape index: {1}]  }
   0x1   :  { %16 = vsyncpa [#allocation5], 0 }
   0x2   :  { %17 = vsyncpa [#allocation8], 0  ;;  %s461_s30 = smov [#allocation4]   ;;  %s462_s11 = smov [#allocation7]  }
   0x3   :  { %s40_s10 = sshll.u32 %s461_s30, 4  ;;  %s62_s12 = sshll.u32 %s462_s11, 4  ;;  %s41_s10 = int_to_ptr.vmem [resolvable:$true] %s40_s10  ;;  %s63_s12 = int_to_ptr.vmem [resolvable:$true] %s62_s12 }
   0x4   :  { %s363_s13 = scalar_lea.vmem %s41_s10, 16  ;;  %s367_s14 = scalar_lea.vmem %s41_s10, 32 }
   0x5   :  { %p364_p0 = scmp.ne.s32.totalorder %s41_s10, %s363_s13  ;;  %p368_p1 = scmp.lt.s32.totalorder %s41_s10, %s41_s10 }
   0x6   :  { %p369_p2 = scmp.lt.s32.totalorder %s367_s14, %s363_s13 }
   0x8   :  { %p370_p3 = por %p369_p2, %p368_p1 }
   0xa   :  { %p371_p4 = pnand %p370_p3, %p364_p0 }
   0xc   :  { %374 = shalt.err (!%p371_p4)
}
   0xd   :  { %43 = dma.hbm_to_vmem [thread:$0]  %s557_s3, 16, %s41_s10, [#allocation5]  }
   0xe   :  { %s383_s17 = scalar_lea.vmem %s63_s12, 64  ;;  %p388_p6 = scmp.lt.s32.totalorder %s63_s12, %s63_s12 }
   0xf   :  { %p384_p5 = scmp.ne.s32.totalorder %s63_s12, %s383_s17  ;;  %p389_p7 = scmp.lt.s32.totalorder %s383_s17, %s383_s17 }
  0x11   :  { %p390_p8 = por %p389_p7, %p388_p6 }
  0x13   :  { %p391_p9 = pnand %p390_p8, %p384_p5 }
  0x15   :  { %394 = shalt.err (!%p391_p9)
}
  0x16   :  { %65 = dma.hbm_to_vmem [thread:$0]  %s560_s6, 64, %s63_s12, [#allocation8]  }
  0x17   :  { %s463_s20 = smov [#allocation2]  }
  0x18   :  { %s27_s21 = sshll.u32 %s463_s20, 4  ;;  %s28_s21 = int_to_ptr.vmem [resolvable:$true] %s27_s21 }
  0x19   :  { %s403_s22 = scalar_lea.vmem %s28_s21, 128  ;;  %p408_p11 = scmp.lt.s32.totalorder %s28_s21, %s28_s21 }
  0x1a   :  { %p404_p10 = scmp.ne.s32.totalorder %s28_s21, %s403_s22  ;;  %p409_p12 = scmp.lt.s32.totalorder %s403_s22, %s403_s22 }
  0x1c   :  { %p410_p13 = por %p409_p12, %p408_p11 }
  0x1e   :  { %p411_p0 = pnand %p410_p13, %p404_p10 }
  0x20   :  { %414 = shalt.err (!%p411_p0)
}
  0x21   :  { %s464_s3 = smov 64   ;;  %s465_s23 = smov 4  }
  0x22   :  { %33 = dma.hbm_to_vmem [thread:$0]  %s556_s2, 128, %s28_s21, [#allocation3], %s464_s3, %s464_s3, %s465_s23  }
  0x23   :  { %s466_s26 = smov [#allocation6]   ;;  %s467_s6 = smov [#allocation9]  }
  0x24   :  { %s52_s27 = sshll.u32 %s466_s26, 4  ;;  %s72_s28 = sshll.u32 %s467_s6, 4  ;;  %s53_s27 = int_to_ptr.vmem [resolvable:$true] %s52_s27  ;;  %s73_s28 = int_to_ptr.vmem [resolvable:$true] %s72_s28 }
  0x25   :  { %s423_s29 = scalar_lea.vmem %s53_s27, 16  ;;  %s427_s30 = scalar_lea.vmem %s53_s27, 32 }
  0x26   :  { %p424_p1 = scmp.ne.s32.totalorder %s53_s27, %s423_s29  ;;  %p428_p2 = scmp.lt.s32.totalorder %s53_s27, %s53_s27 }
  0x27   :  { %p429_p3 = scmp.lt.s32.totalorder %s427_s30, %s423_s29 }
  0x29   :  { %p430_p4 = por %p429_p3, %p428_p2 }
  0x2b   :  { %p431_p5 = pnand %p430_p4, %p424_p1 }
  0x2d   :  { %434 = shalt.err (!%p431_p5)
}
  0x2e   :  { %55 = dma.hbm_to_vmem [thread:$0]  %s559_s5, 16, %s53_s27, [#allocation5]  }
  0x2f   :  { %s443_s12 = scalar_lea.vmem %s73_s28, 16  ;;  %s447_s2 = scalar_lea.vmem %s73_s28, 32 }
  0x30   :  { %p444_p6 = scmp.ne.s32.totalorder %s73_s28, %s443_s12  ;;  %p448_p7 = scmp.lt.s32.totalorder %s73_s28, %s73_s28 }
  0x31   :  { %p449_p8 = scmp.lt.s32.totalorder %s447_s2, %s443_s12 }
  0x33   :  { %p450_p9 = por %p449_p8, %p448_p7 }
  0x35   :  { %p451_p10 = pnand %p450_p9, %p444_p6 }
  0x37   :  { %454 = shalt.err (!%p451_p10)
}
  0x38   :  { %75 = dma.hbm_to_vmem [thread:$0]  %s561_s7, 16, %s73_s28, [#allocation8]  }
  0x39   :  { %455 = dma.done.wait [#allocation3], 128  }
  0x3a   :  { %456 = vsyncadd [#allocation3], 4294967168 }
  0x3b   :  { %457 = dma.done.wait [#allocation5], 32  }
  0x3c   :  { %458 = vsyncadd [#allocation5], 4294967264 }
  0x3d   :  { %459 = dma.done.wait [#allocation8], 80  }
  0x3e   :  { %460 = vsyncadd [#allocation8], 4294967216  ;;  %v468_v0 = vmov 0.0   ;;  %vm469_vm0 = vmmov 0   ;;  %v350_v1 = vld [vmem:[#allocation2] sm:$0xff]   ;;  %vm108_vm1 = vcmask 130048  }
  0x3f   :  { %320 = vmatprep.subr.bf16.mxu0 %v468_v0  ;;  %322 = vmatprep.mubr.msk.bf16.mxu0 %vm469_vm0, %v468_v0  ;;  %v92_v2 = vld [vmem:[%s554_s0] sm:$0xf]  ;;  %v351_v3 = vld [vmem:[%s558_s4 + $0x8] sm:$0xff]   ;;  %vm177_vm2 = vcmask 261120   ;;  %vm245_vm3 = vcmask 1043456   ;;  %s470_s19 = smov 120  }
  0x40   :  { %326 = vmatprep.subr.bf16.mxu1 %v468_v0  ;;  %330 = vmatprep.mubr.msk.bf16.mxu1 %vm469_vm0, %v468_v0  ;;  %v352_v4 = vld [vmem:[%s558_s4] sm:$0xff]   ;;  %v304_v5 = vld [vmem:[#allocation4] ss:$0 sm:$0xff]  ;;  %v233_v13 = vld [vmem:[#allocation7] sm:$0xf]  ;;  %vm241_vm4 = vcmask 64512  }
  0x41   :  { %321 = vmatpush3.bf16.msra.mxu0 %v350_v1  ;;  %327 = vmatpush3.bf16.msra.mxu1 %v351_v3  ;;  %v247_v14 = vsel %vm245_vm3, %v233_v13, 0  ;;  %v307_v15 = vld [vmem:[#allocation6] ss:$0 sm:$0xff]  ;;  %v222_v24 = vld [vmem:[%s555_s1] sm:$0xff]  ;;  %v311_v29 = vld [vmem:[#allocation9] ss:$0 sm:$0xff] }
  0x42   :  { %334 = vmatprep.subr.bf16.mxu0 %v468_v0  ;;  %328 = vmatprep.subr.bf16.mxu1 %v468_v0  ;;  %vm291_vm5 = vcmask 257024  }
  0x44   :  { %323 = vmatmul.mubr.msk.bf16.vlgmr.msra.gmra.mxu0 %vm108_vm1, %v92_v2 }
  0x45   :  { %336 = vmatprep.mubr.msk.bf16.mxu0 %vm469_vm0, %v468_v0  ;;  %329 = vmatpush3.bf16.msra.mxu1 %v352_v4 }
  0x46   :  { %335 = vmatpush3.bf16.msra.mxu0 %v247_v14 }
 0x104   :  { %v146_v6 = vpop.f32.mrf.mxu0 }
 0x105   :  { %v147_v7 = vadd.f32 %v304_v5, %v146_v6 }
 0x106   :  { %v324_v8 = vpop.f32.mrf.mxu0 }
 0x107   :  { %v152_v9 = vmax.f32 %v147_v7, 0.0 }
 0x108   :  { %v149_v10 = vpop.f32.mrf.mxu0 }
 0x109   :  { %v153_v11 = vpack.c.bf16 %v152_v9, %v152_v9 }
 0x10a   :  { %v325_v12 = vpop.f32.mrf.mxu0 }
 0x10b   :  { %331 = vmatmul.mubr.msk.bf16.vlgmr.msra.gmra.mxu1 %vm177_vm2, %v153_v11 }
 0x1cb   :  { %v215_v16 = vpop.f32.mrf.mxu1 }
 0x1cc   :  { %v216_v17 = vadd.f32 %v307_v15, %v215_v16 }
 0x1cd   :  { %v332_v18 = vpop.f32.mrf.mxu1 }
 0x1ce   :  { %221 = vst [vmem:[%s562_s8] sm:$0xff] %v216_v17  ;;  %v223_v19 = vmul.f32 0.5, %v216_v17 }
 0x1cf   :  { %v218_v20 = vpop.f32.mrf.mxu1 }
 0x1d0   :  { %v224_v21 = vmul.f32 1.442695, %v223_v19 }
 0x1d1   :  { %v333_v22 = vpop.f32.mrf.mxu1 }
 0x1d2   :  { %353 = vpow2.f32 %v224_v21 }
 0x1df   :  { %v354_v23 = vpop.eup %353 }
 0x1e0   :  { %227 = vrot.lane.b32.xlu0 %v354_v23, %s470_s19 }
 0x252   :  { %v228_v25 = vpop.permute.xlu0 %227 }
 0x253   :  { %v230_v26 = vmul.f32 %v228_v25, %v222_v24 }
 0x255   :  { %v231_v27 = vadd.f32 %v230_v26, %v216_v17 }
 0x257   :  { %v232_v28 = vpack.c.bf16 %v231_v27, %v231_v27 }
 0x259   :  { %337 = vmatmul.mubr.msk.bf16.vlgmr.msra.gmra.mxu0 %vm241_vm4, %v232_v28 }
 0x319   :  { %v283_v30 = vpop.f32.mrf.mxu0 }
 0x31a   :  { %v284_v31 = vadd.f32 %v311_v29, %v283_v30 }
 0x31b   :  { %v338_v32 = vpop.f32.mrf.mxu0 }
 0x31c   :  { %v289_v33 = vmax.f32 %v284_v31, 0.0 }
 0x31d   :  { %v286_v34 = vpop.f32.mrf.mxu0 }
 0x31e   :  { %v290_v35 = vpack.c.bf16 %v289_v33, %v289_v33 }
 0x31f   :  { %v339_v36 = vpop.f32.mrf.mxu0 }
 0x320   :  { %292 = vst.msk [vmem:[%s563_s9] sm:$0xf] %vm291_vm5, %v290_v35 }
 0x321   :  { %301 = vsyncpa [#allocation3], 1 }
 0x322   :  { %302 = vsyncpa [#allocation5], 1 }
 0x323   :  { %303 = vsyncpa [#allocation8], 1 }

</bundles_post_ra>
